<compile_context>
chip_gen: v7x
topology: tpu7x:2x2x1
jax: 0.10.0
libtpu: 0.0.40
codegen_flags: <defaults>
</compile_context>

<pallas_src>
import functools

import jax
import jax.numpy as jnp
from jax.experimental import pallas as pl
from jax.experimental.pallas import tpu as pltpu

_NEG_MASK = 100000000.0


def _hypergraph_decoder_kernel(enc_row_ref, enc_col_ref, wl_ref, wr_ref,
                               u_ref, bias_ref, uni_ref,
                               score_ref, ent_ref, samp_ref, *,
                               tile_i, tile_j, activation, use_bias, act_dtype):
    i = pl.program_id(1)
    j = pl.program_id(2)

    enc_row = enc_row_ref[...]      # (Ti, E)  rows of this logit tile
    enc_col = enc_col_ref[...]      # (Tj, E)  columns of this logit tile
    u_row = u_ref[...]              # (1, H)

    # Row / column projections -> MXU.
    dot_l = jnp.dot(enc_row, wl_ref[...], preferred_element_type=jnp.float32)
    dot_r = jnp.dot(enc_col, wr_ref[...], preferred_element_type=jnp.float32)

    if activation == 'none':
        # Without the nonlinearity the bilinear form is separable: skip the
        # (Ti, Tj, H) slab entirely.
        ll = jnp.sum(dot_l * u_row, axis=-1, keepdims=True)       # (Ti, 1)
        rr = jnp.sum(dot_r * u_row, axis=-1, keepdims=True)       # (Tj, 1)
        logits = ll + rr.reshape(1, tile_j)                       # (Ti, Tj)
    else:
        s = dot_l[:, None, :] + dot_r[None, :, :]                 # (Ti, Tj, H)
        if act_dtype != jnp.float32:
            s = s.astype(act_dtype)                               # bf16 EUP path
        if activation == 'tanh':
            s = jnp.tanh(s)
        elif activation == 'relu':
            s = jnp.maximum(s, 0.0)
        else:
            raise NotImplementedError(
                'Current decoder activation is not implemented yet')
        # Reduce the hidden dim against U; accumulate in f32.
        logits = jnp.sum(s.astype(jnp.float32) * u_row[None, :, :], axis=-1)

    if use_bias:
        logits = logits + bias_ref[0]                             # SMEM scalar

    # Diagonal mask with *global* row / column indices: row r masks column r,
    # exactly the per-row scatter-of-ones in the PyTorch loop.
    row = jax.lax.broadcasted_iota(jnp.int32, (tile_i, tile_j), 0) + i * tile_i
    col = jax.lax.broadcasted_iota(jnp.int32, (tile_i, tile_j), 1) + j * tile_j
    masked = logits - _NEG_MASK * (row == col).astype(jnp.float32)

    # Bernoulli(logits=masked): numerically stable sigmoid / softplus in f32
    # so sigmoid(-1e8) == 0 exactly (diagonal sample forced to 0).
    z = jnp.exp(-jnp.abs(masked))
    inv = 1.0 / (1.0 + z)
    p = jnp.where(masked >= 0, inv, z * inv)
    softplus = jnp.maximum(masked, 0.0) + jnp.log(1.0 + z)
    entropy = softplus - masked * p

    score_ref[...] = masked
    ent_ref[...] = entropy
    samp_ref[...] = (uni_ref[...] < p).astype(jnp.float32)


def hypergraph_decoder_forward(encoder_output, wl, wr, u, bias, rng_key, *,
                               activation='tanh', use_bias=True,
                               act_dtype=jnp.float32):
    if activation not in ('tanh', 'relu', 'none'):
        raise NotImplementedError(
            'Current decoder activation is not implemented yet')

    encoder_output = encoder_output.astype(jnp.float32)
    B, N, E = encoder_output.shape
    H = wl.shape[1]

    # Tile the (N, N) logit plane: 128x128 lane-dense tiles whenever N allows,
    # otherwise the whole plane as a single block (small-N fallback; blocks
    # equal to the full dims always satisfy the (8, 128) rule).
    tile = 128 if (N >= 128 and N % 128 == 0) else N
    tile_i = tile_j = tile
    grid = (B, N // tile_i, N // tile_j)

    u_row = u.reshape(1, H).astype(jnp.float32)
    bias1 = bias.reshape(1).astype(jnp.float32)
    # Portable, decorrelated Bernoulli uniforms (replaces pltpu.prng_*).
    uniforms = jax.random.uniform(rng_key, (B, N, N), dtype=jnp.float32)

    kernel = functools.partial(
        _hypergraph_decoder_kernel, tile_i=tile_i, tile_j=tile_j,
        activation=activation, use_bias=use_bias, act_dtype=act_dtype)

    out_shape = (
        jax.ShapeDtypeStruct((B, N, N), jnp.float32),   # mask_scores
        jax.ShapeDtypeStruct((B, N, N), jnp.float32),   # entropy
        jax.ShapeDtypeStruct((B, N, N), jnp.float32),   # samples
    )

    plane_spec = pl.BlockSpec((None, tile_i, tile_j), lambda b, i, j: (b, i, j))
    in_specs = [
        pl.BlockSpec((None, tile_i, E), lambda b, i, j: (b, i, 0)),  # enc rows
        pl.BlockSpec((None, tile_j, E), lambda b, i, j: (b, j, 0)),  # enc cols
        pl.BlockSpec((E, H), lambda b, i, j: (0, 0)),                # W_l
        pl.BlockSpec((E, H), lambda b, i, j: (0, 0)),                # W_r
        pl.BlockSpec((1, H), lambda b, i, j: (0, 0)),                # U
        pl.BlockSpec(memory_space=pltpu.MemorySpace.SMEM),           # bias
        plane_spec,                                                  # uniforms
    ]
    out_specs = (plane_spec, plane_spec, plane_spec)

    masked_scores, entropy, samples = pl.pallas_call(
        kernel,
        grid=grid,
        in_specs=in_specs,
        out_specs=out_specs,
        out_shape=out_shape,
        compiler_params=pltpu.CompilerParams(
            dimension_semantics=("parallel", "parallel", "parallel"),
            vmem_limit_bytes=48 * 1024 * 1024),
    )(encoder_output, encoder_output, wl.astype(jnp.float32),
      wr.astype(jnp.float32), u_row, bias1, uniforms)

    # Mirror the PyTorch return structure: lists of length nodes_num,
    # each entry of shape (B, N).
    samples_list = [samples[:, i, :] for i in range(N)]
    scores_list = [masked_scores[:, i, :] for i in range(N)]
    entropy_list = [entropy[:, i, :] for i in range(N)]
    return samples_list, scores_list, entropy_list


def _xavier_uniform(key, shape):
    fan_in, fan_out = shape[0], shape[1]
    bound = (6.0 / (fan_in + fan_out)) ** 0.5
    return jax.random.uniform(key, shape, jnp.float32, -bound, bound)


def _reference_scores_entropy(encoder_output, wl, wr, u, bias, activation, use_bias):
    hp = jax.lax.Precision.HIGHEST
    dot_l = jnp.einsum('ijk,kl->ijl', encoder_output, wl, precision=hp)
    dot_r = jnp.einsum('ijk,kl->ijl', encoder_output, wr, precision=hp)
    s = dot_l[:, :, None, :] + dot_r[:, None, :, :]
    if activation == 'tanh':
        s = jnp.tanh(s)
    elif activation == 'relu':
        s = jnp.maximum(s, 0.0)
    logits = jnp.einsum('ijkl,l->ijk', s, u.reshape(-1), precision=hp)
    if use_bias:
        logits = logits + bias[0]
    N = encoder_output.shape[1]
    masked = logits - _NEG_MASK * jnp.eye(N, dtype=jnp.float32)[None]
    p = jax.nn.sigmoid(masked)
    ent = jax.nn.softplus(masked) - masked * p
    return masked, ent


if __name__ == "__main__":
    # Small, module-consistent shapes.
    batch_size = 2
    nodes_num = 8
    input_embed = 16
    decoder_hidden_dim = 32
    decoder_activation = 'tanh'
    use_bias = True
    bias_initial_value = 0.5   # use_bias_constant=True

    key = jax.random.PRNGKey(0)
    k_enc, k_wl, k_wr, k_u, k_sample = jax.random.split(key, 5)

    encoder_output = jax.random.normal(
        k_enc, (batch_size, nodes_num, input_embed), jnp.float32)
    wl = _xavier_uniform(k_wl, (input_embed, decoder_hidden_dim))
    wr = _xavier_uniform(k_wr, (input_embed, decoder_hidden_dim))
    u = _xavier_uniform(k_u, (decoder_hidden_dim, 1))
    bias = jnp.full((1,), bias_initial_value, jnp.float32)

    samples, mask_scores, entropy = hypergraph_decoder_forward(
        encoder_output, wl, wr, u, bias, k_sample,
        activation=decoder_activation, use_bias=use_bias)

    jax.block_until_ready(samples)
    jax.block_until_ready(mask_scores)
    jax.block_until_ready(entropy)

    # Deterministic pieces checked against a pure-JAX reference.
    ref_scores, ref_ent = _reference_scores_entropy(
        encoder_output, wl, wr, u, bias, decoder_activation, use_bias)
    got_scores = jnp.stack(mask_scores, axis=1)
    got_ent = jnp.stack(entropy, axis=1)
    assert jnp.allclose(got_scores, ref_scores, rtol=1e-3, atol=1e-3), \
        float(jnp.max(jnp.abs(got_scores - ref_scores)))
    assert jnp.allclose(got_ent, ref_ent, rtol=1e-3, atol=1e-3), \
        float(jnp.max(jnp.abs(got_ent - ref_ent)))
    # Samples are {0,1} and forced to 0 on the masked diagonal.
    got_samp = jnp.stack(samples, axis=1)
    assert jnp.all((got_samp == 0.0) | (got_samp == 1.0))
    assert jnp.all(jnp.diagonal(got_samp, axis1=1, axis2=2) == 0.0)

    print("KERNEL_OK")
</pallas_src>

<mosaic_0001>
module attributes {stable_mosaic.version = 11 : i64} {
  func.func @_hypergraph_decoder_kernel(%arg0: i32, %arg1: i32, %arg2: i32, %arg3: memref<1x8x16xf32, #tpu.memory_space<vmem>>, %arg4: memref<1x8x16xf32, #tpu.memory_space<vmem>>, %arg5: memref<16x32xf32, #tpu.memory_space<vmem>>, %arg6: memref<16x32xf32, #tpu.memory_space<vmem>>, %arg7: memref<1x32xf32, #tpu.memory_space<vmem>>, %arg8: memref<1xf32, #tpu.memory_space<smem>>, %arg9: memref<1x8x8xf32, #tpu.memory_space<vmem>>, %arg10: memref<1x8x8xf32, #tpu.memory_space<vmem>>, %arg11: memref<1x8x8xf32, #tpu.memory_space<vmem>>, %arg12: memref<1x8x8xf32, #tpu.memory_space<vmem>>) attributes {dimension_semantics = [#tpu.dimension_semantics<parallel>, #tpu.dimension_semantics<parallel>, #tpu.dimension_semantics<parallel>], iteration_bounds = array<i64: 2, 1, 1>, scalar_prefetch = 0 : i64, scratch_operands = 0 : i64, tpu.core_type = #tpu.core_type<tc>, window_params = [{transform_indices = @transform_0, window_bounds = array<i64: 1, 8, 16>}, {transform_indices = @transform_1, window_bounds = array<i64: 1, 8, 16>}, {pipeline_mode = #tpu.pipeline_mode<synchronous>, transform_indices = @transform_2, window_bounds = array<i64: 16, 32>}, {pipeline_mode = #tpu.pipeline_mode<synchronous>, transform_indices = @transform_3, window_bounds = array<i64: 16, 32>}, {pipeline_mode = #tpu.pipeline_mode<synchronous>, transform_indices = @transform_4, window_bounds = array<i64: 1, 32>}, {transform_indices = @transform_5, window_bounds = array<i64: 1>}, {transform_indices = @transform_6, window_bounds = array<i64: 1, 8, 8>}, {transform_indices = @transform_7, window_bounds = array<i64: 1, 8, 8>}, {transform_indices = @transform_8, window_bounds = array<i64: 1, 8, 8>}, {transform_indices = @transform_9, window_bounds = array<i64: 1, 8, 8>}]} {
    %c0 = arith.constant 0 : index
    %c0_0 = arith.constant 0 : index
    %c0_1 = arith.constant 0 : index
    %0 = vector.load %arg3[%c0, %c0_0, %c0_1] : memref<1x8x16xf32, #tpu.memory_space<vmem>>, vector<1x8x16xf32>
    %1 = vector.shape_cast %0 : vector<1x8x16xf32> to vector<8x16xf32>
    %c0_2 = arith.constant 0 : index
    %c0_3 = arith.constant 0 : index
    %c0_4 = arith.constant 0 : index
    %2 = vector.load %arg4[%c0_2, %c0_3, %c0_4] : memref<1x8x16xf32, #tpu.memory_space<vmem>>, vector<1x8x16xf32>
    %3 = vector.shape_cast %2 : vector<1x8x16xf32> to vector<8x16xf32>
    %c0_5 = arith.constant 0 : index
    %c0_6 = arith.constant 0 : index
    %4 = vector.load %arg7[%c0_5, %c0_6] : memref<1x32xf32, #tpu.memory_space<vmem>>, vector<1x32xf32>
    %c0_7 = arith.constant 0 : index
    %c0_8 = arith.constant 0 : index
    %5 = vector.load %arg5[%c0_7, %c0_8] : memref<16x32xf32, #tpu.memory_space<vmem>>, vector<16x32xf32>
    %cst = arith.constant dense<0.000000e+00> : vector<8x32xf32>
    %6 = tpu.matmul %1, %5, %cst {dimension_numbers = #tpu.dot_dimension_numbers<[1], [0], [0], [1], [0, 0, 1, 1], [], []>} : vector<8x16xf32>, vector<16x32xf32>, vector<8x32xf32> -> vector<8x32xf32>
    %c0_9 = arith.constant 0 : index
    %c0_10 = arith.constant 0 : index
    %7 = vector.load %arg6[%c0_9, %c0_10] : memref<16x32xf32, #tpu.memory_space<vmem>>, vector<16x32xf32>
    %cst_11 = arith.constant dense<0.000000e+00> : vector<8x32xf32>
    %8 = tpu.matmul %3, %7, %cst_11 {dimension_numbers = #tpu.dot_dimension_numbers<[1], [0], [0], [1], [0, 0, 1, 1], [], []>} : vector<8x16xf32>, vector<16x32xf32>, vector<8x32xf32> -> vector<8x32xf32>
    %9 = vector.shape_cast %6 : vector<8x32xf32> to vector<8x1x32xf32>
    %10 = vector.shape_cast %8 : vector<8x32xf32> to vector<1x8x32xf32>
    %11 = vector.broadcast %9 : vector<8x1x32xf32> to vector<8x8x32xf32>
    %12 = vector.broadcast %10 : vector<1x8x32xf32> to vector<8x8x32xf32>
    %13 = arith.addf %11, %12 : vector<8x8x32xf32>
    %14 = math.tanh %13 : vector<8x8x32xf32>
    %15 = vector.shape_cast %4 : vector<1x32xf32> to vector<1x1x32xf32>
    %16 = vector.broadcast %15 : vector<1x1x32xf32> to vector<8x8x32xf32>
    %17 = arith.mulf %14, %16 : vector<8x8x32xf32>
    %cst_12 = arith.constant dense<0.000000e+00> : vector<8x8xf32>
    %18 = vector.multi_reduction <add>, %17, %cst_12 [2] : vector<8x8x32xf32> to vector<8x8xf32>
    %c0_13 = arith.constant 0 : index
    %19 = memref.load %arg8[%c0_13] : memref<1xf32, #tpu.memory_space<smem>>
    %20 = vector.broadcast %19 : f32 to vector<8x8xf32>
    %21 = arith.addf %18, %20 : vector<8x8xf32>
    %22 = tpu.iota {dimensions = array<i32: 0>} : vector<8x8xi32>
    %c8_i32 = arith.constant 8 : i32
    %23 = arith.muli %arg1, %c8_i32 : i32
    %24 = vector.broadcast %23 : i32 to vector<8x8xi32>
    %25 = arith.addi %22, %24 : vector<8x8xi32>
    %26 = tpu.iota {dimensions = array<i32: 1>} : vector<8x8xi32>
    %c8_i32_14 = arith.constant 8 : i32
    %27 = arith.muli %arg2, %c8_i32_14 : i32
    %28 = vector.broadcast %27 : i32 to vector<8x8xi32>
    %29 = arith.addi %26, %28 : vector<8x8xi32>
    %30 = arith.cmpi eq, %25, %29 : vector<8x8xi32>
    %31 = arith.extui %30 : vector<8x8xi1> to vector<8x8xi32>
    %32 = arith.sitofp %31 : vector<8x8xi32> to vector<8x8xf32>
    %cst_15 = arith.constant 1.000000e+08 : f32
    %33 = vector.broadcast %cst_15 : f32 to vector<8x8xf32>
    %34 = arith.mulf %33, %32 : vector<8x8xf32>
    %35 = arith.subf %21, %34 : vector<8x8xf32>
    %36 = math.absf %35 : vector<8x8xf32>
    %cst_16 = arith.constant 0.000000e+00 : f32
    %37 = vector.broadcast %cst_16 : f32 to vector<8x8xf32>
    %38 = arith.subf %37, %36 : vector<8x8xf32>
    %39 = math.exp %38 : vector<8x8xf32>
    %cst_17 = arith.constant 1.000000e+00 : f32
    %40 = vector.broadcast %cst_17 : f32 to vector<8x8xf32>
    %41 = arith.addf %40, %39 : vector<8x8xf32>
    %cst_18 = arith.constant 1.000000e+00 : f32
    %42 = vector.broadcast %cst_18 : f32 to vector<8x8xf32>
    %43 = arith.divf %42, %41 : vector<8x8xf32>
    %cst_19 = arith.constant 0.000000e+00 : f32
    %44 = vector.broadcast %cst_19 : f32 to vector<8x8xf32>
    %45 = arith.cmpf oge, %35, %44 : vector<8x8xf32>
    %46 = arith.mulf %39, %43 : vector<8x8xf32>
    %47 = arith.select %45, %43, %46 : vector<8x8xi1>, vector<8x8xf32>
    %cst_20 = arith.constant 0.000000e+00 : f32
    %48 = vector.broadcast %cst_20 : f32 to vector<8x8xf32>
    %49 = arith.maximumf %35, %48 : vector<8x8xf32>
    %cst_21 = arith.constant 1.000000e+00 : f32
    %50 = vector.broadcast %cst_21 : f32 to vector<8x8xf32>
    %51 = arith.addf %50, %39 : vector<8x8xf32>
    %52 = math.log %51 : vector<8x8xf32>
    %53 = arith.addf %49, %52 : vector<8x8xf32>
    %54 = arith.mulf %35, %47 : vector<8x8xf32>
    %55 = arith.subf %53, %54 : vector<8x8xf32>
    %c0_22 = arith.constant 0 : index
    %c0_23 = arith.constant 0 : index
    %c0_24 = arith.constant 0 : index
    %56 = vector.load %arg10[%c0_22, %c0_23, %c0_24] : memref<1x8x8xf32, #tpu.memory_space<vmem>>, vector<1x8x8xf32>
    %57 = vector.shape_cast %56 : vector<1x8x8xf32> to vector<8x8xf32>
    %58 = vector.shape_cast %35 : vector<8x8xf32> to vector<1x8x8xf32>
    tpu.vector_store %arg10[%c0_22, %c0_23, %c0_24], %58 {strides = array<i32>} : memref<1x8x8xf32, #tpu.memory_space<vmem>>, vector<1x8x8xf32>,
    %c0_25 = arith.constant 0 : index
    %c0_26 = arith.constant 0 : index
    %c0_27 = arith.constant 0 : index
    %59 = vector.load %arg11[%c0_25, %c0_26, %c0_27] : memref<1x8x8xf32, #tpu.memory_space<vmem>>, vector<1x8x8xf32>
    %60 = vector.shape_cast %59 : vector<1x8x8xf32> to vector<8x8xf32>
    %61 = vector.shape_cast %55 : vector<8x8xf32> to vector<1x8x8xf32>
    tpu.vector_store %arg11[%c0_25, %c0_26, %c0_27], %61 {strides = array<i32>} : memref<1x8x8xf32, #tpu.memory_space<vmem>>, vector<1x8x8xf32>,
    %c0_28 = arith.constant 0 : index
    %c0_29 = arith.constant 0 : index
    %c0_30 = arith.constant 0 : index
    %62 = vector.load %arg9[%c0_28, %c0_29, %c0_30] : memref<1x8x8xf32, #tpu.memory_space<vmem>>, vector<1x8x8xf32>
    %63 = vector.shape_cast %62 : vector<1x8x8xf32> to vector<8x8xf32>
    %64 = arith.cmpf olt, %63, %47 : vector<8x8xf32>
    %65 = arith.extui %64 : vector<8x8xi1> to vector<8x8xi32>
    %66 = arith.sitofp %65 : vector<8x8xi32> to vector<8x8xf32>
    %c0_31 = arith.constant 0 : index
    %c0_32 = arith.constant 0 : index
    %c0_33 = arith.constant 0 : index
    %67 = vector.load %arg12[%c0_31, %c0_32, %c0_33] : memref<1x8x8xf32, #tpu.memory_space<vmem>>, vector<1x8x8xf32>
    %68 = vector.shape_cast %67 : vector<1x8x8xf32> to vector<8x8xf32>
    %69 = vector.shape_cast %66 : vector<8x8xf32> to vector<1x8x8xf32>
    tpu.vector_store %arg12[%c0_31, %c0_32, %c0_33], %69 {strides = array<i32>} : memref<1x8x8xf32, #tpu.memory_space<vmem>>, vector<1x8x8xf32>,
    return
  }
  func.func @transform_0(%arg0: i32, %arg1: i32, %arg2: i32) -> (i32, i32, i32) {
    %c0_i32 = arith.constant 0 : i32
    %c0_i32_0 = arith.constant 0 : i32
    return %arg0, %arg1, %c0_i32 : i32, i32, i32
  }
  func.func @transform_1(%arg0: i32, %arg1: i32, %arg2: i32) -> (i32, i32, i32) {
    %c0_i32 = arith.constant 0 : i32
    %c0_i32_0 = arith.constant 0 : i32
    return %arg0, %arg2, %c0_i32 : i32, i32, i32
  }
  func.func @transform_2(%arg0: i32, %arg1: i32, %arg2: i32) -> (i32, i32) {
    %c0_i32 = arith.constant 0 : i32
    %c0_i32_0 = arith.constant 0 : i32
    %c0_i32_1 = arith.constant 0 : i32
    return %c0_i32, %c0_i32_0 : i32, i32
  }
  func.func @transform_3(%arg0: i32, %arg1: i32, %arg2: i32) -> (i32, i32) {
    %c0_i32 = arith.constant 0 : i32
    %c0_i32_0 = arith.constant 0 : i32
    %c0_i32_1 = arith.constant 0 : i32
    return %c0_i32, %c0_i32_0 : i32, i32
  }
  func.func @transform_4(%arg0: i32, %arg1: i32, %arg2: i32) -> (i32, i32) {
    %c0_i32 = arith.constant 0 : i32
    %c0_i32_0 = arith.constant 0 : i32
    %c0_i32_1 = arith.constant 0 : i32
    return %c0_i32, %c0_i32_0 : i32, i32
  }
  func.func @transform_5(%arg0: i32, %arg1: i32, %arg2: i32) -> i32 {
    %c0_i32 = arith.constant 0 : i32
    %c0_i32_0 = arith.constant 0 : i32
    return %c0_i32 : i32
  }
  func.func @transform_6(%arg0: i32, %arg1: i32, %arg2: i32) -> (i32, i32, i32) {
    %c0_i32 = arith.constant 0 : i32
    return %arg0, %arg1, %arg2 : i32, i32, i32
  }
  func.func @transform_7(%arg0: i32, %arg1: i32, %arg2: i32) -> (i32, i32, i32) {
    %c0_i32 = arith.constant 0 : i32
    return %arg0, %arg1, %arg2 : i32, i32, i32
  }
  func.func @transform_8(%arg0: i32, %arg1: i32, %arg2: i32) -> (i32, i32, i32) {
    %c0_i32 = arith.constant 0 : i32
    return %arg0, %arg1, %arg2 : i32, i32, i32
  }
  func.func @transform_9(%arg0: i32, %arg1: i32, %arg2: i32) -> (i32, i32, i32) {
    %c0_i32 = arith.constant 0 : i32
    return %arg0, %arg1, %arg2 : i32, i32, i32
  }
}

</mosaic_0001>

<bundles_post_ra>
// kernel: tpu_custom_call.1
= control target key start
LH: loop header
LB: loop body
LE: loop exit
PB: predicated region body
PF: predicated region fallthrough
CT: control target
= control target key end

     0   :  { %s2657_s0 = inlined_call_operand.hbm [shape: f32[2,8,16], index: 0, kind: input, shape index: {}]   ;;  %s2658_s1 = inlined_call_operand.hbm [shape: f32[2,8,16], index: 1, kind: input, shape index: {}]   ;;  %s2659_s2 = inlined_call_operand.hbm [shape: f32[16,32], index: 2, kind: input, shape index: {}]   ;;  %s2660_s3 = inlined_call_operand.hbm [shape: f32[16,32], index: 3, kind: input, shape index: {}]   ;;  %s2661_s4 = inlined_call_operand.vmem [shape: f32[1,32], index: 4, kind: input, shape index: {}]   ;;  %s2662_s5 = inlined_call_operand.<no memory space> [shape: f32[1], index: 5, kind: input, shape index: {}]   ;;  %s2663_s6 = inlined_call_operand.vmem [shape: f32[2,8,8], index: 6, kind: input, shape index: {}]   ;;  %s2664_s7 = inlined_call_operand.hbm [shape: f32[2,8,8], index: 7, kind: output, shape index: {0}]   ;;  %s2665_s8 = inlined_call_operand.hbm [shape: f32[2,8,8], index: 8, kind: output, shape index: {1}]   ;;  %s2666_s9 = inlined_call_operand.hbm [shape: f32[2,8,8], index: 9, kind: output, shape index: {2}]  }
   0x1   :  { %2676 = sst [smem:[#allocation26_spill]] %s2659_s2 }
   0x2   :  { %2677 = sst [smem:[#allocation27_spill]] %s2660_s3 }
   0x3   :  { %15 = sst [smem:[#allocation2]] %s2662_s5 }
   0x4   :  { %16 = vsyncpa [#allocation4], 0 }
   0x5   :  { %18 = vsyncpa [#allocation4 + $0x1], 0 }
   0x6   :  { %19 = vsyncpa [#allocation7], 0 }
   0x7   :  { %21 = vsyncpa [#allocation7 + $0x1], 0 }
   0x8   :  { %22 = vsyncpa [#allocation10], 0 }
   0x9   :  { %23 = vsyncpa [#allocation5], 0 }
   0xa   :  { %25 = vsyncpa [#allocation5 + $0x1], 0 }
   0xb   :  { %26 = vsyncpa [#allocation13], 0 }
   0xc   :  { %28 = vsyncpa [#allocation13 + $0x1], 0  ;;  %s2098_s11 = smov 0   ;;  %s2100_s12 = smov 0  }
   0xd   :  { %s2102_s13 = smov 0   ;;  %s2104_s14 = smov 0  }
   0xe   :  { %s2106_s15 = smov 0   ;;  %s2108_s5 = smov 0  }
   0xf LB: > { %2678 = sst [smem:[#allocation21_spill]] %s2009_s11  ;;  %s2129_s16 = sadd.s32 4294967295, %s2029_s5   ;;  %s2029_s5 = sphi %s2108_s5, %s34_s5   ;;  %s2025_s15 = sphi %s2106_s15, %s2706_s15   ;;  %s2021_s14 = sphi %s2104_s14, %s2705_s14   ;;  %s2017_s13 = sphi %s2102_s13, %s2709_s13   ;;  %s2013_s12 = sphi %s2100_s12, %s2708_s12   ;;  %s2009_s11 = sphi %s2098_s11, %s2707_s11  }
  0x10   : > { %2679 = sst [smem:[#allocation22_spill]] %s2025_s15  ;;  %s2668_s17 = sadd.s32 4294967294, %s2029_s5  }
  0x11   : > { %p75_p0 = scmp.ne.s32.totalorder %s2013_s12, %s2009_s11  ;;  %p2667_p1 = scmp.eq.s32.totalorder %s2129_s16, 0 }
  0x12   : > { %p251_p3 = scmp.eq.s32.totalorder %s2668_s17, 1  ;;  %p1532_p5 = scmp.ge.s32.totalorder %s2029_s5, 1 }
  0x13   : > { %p2140_p4 = por %p2667_p1, %p75_p0  ;;  %p318_p7 = scmp.lt.s32.totalorder %s2029_s5, 3 }
  0x14   : > { %p2145_p6 = por %p251_p3, %p75_p0  ;;  %s2031_s21 = smov [#allocation8]  }
  0x15   : > { %s2680_s18 = scalar_select %p2140_p4, 1, 0 }
  0x16   : > { %s2681_s19 = scalar_select %p2145_p6, 1, 0 }
  0x17   : > { %p2150_p8 = pnand %p1532_p5, %p318_p7  ;;  %s330_s22 = sshll.u32 %s2031_s21, 4  ;;  %s2154_s22 = int_to_ptr.vmem [resolvable:$true] %s330_s22 }
  0x18   : > { %2682 = sst [smem:[#allocation23_spill]] %s2681_s19  ;;  %s2032_s24 = smov [#allocation9]  }
  0x19   : > { %s2683_s20 = scalar_select %p2150_p8, 1, 0 }
  0x1a   : > { %p1606_p9 = pneg %p2150_p8  ;;  %s343_s25 = sshll.u32 %s2032_s24, 4  ;;  %s2165_s25 = int_to_ptr.vmem [resolvable:$true] %s343_s25 }
  0x1b   : > { %s2685_s2 = sld [smem:[#allocation26_spill]] }
  0x1c   : > { %p2161_p11 = pnand %p1606_p9, %p2667_p1 }
  0x1e   : > { %p1761_p13 = pneg %p2161_p11 }
  0x21   : > { %s1759_s28 = scalar_lea.hbm %s2685_s2, 256 }
  0x22   : > { %p1760_p12 = scmp.ne.s32.totalorder %s2685_s2, %s1759_s28  ;;  %p1766_p5 = scmp.lt.u32.totalorder %s1759_s28, %s2685_s2 }
  0x24   : > { %p1762_p0 = pnand %p1761_p13, %p1760_p12 }
  0x26   : > { %p1763_p3 = pneg %p1762_p0 }
  0x28   : > { %p1768_p7 = pnand %p1766_p5, %p1763_p3 }
  0x2a   : > { %1771 = shalt.err (!%p1768_p7)
}
  0x2b   : > { %s1772_s24 = scalar_lea.vmem %s2154_s22, 256  ;;  %p1780_p2 = scmp.lt.s32.totalorder %s2154_s22, %s2154_s22 }
  0x2c   : > { %p1773_p9 = scmp.ne.s32.totalorder %s2154_s22, %s1772_s24  ;;  %p1781_p12 = scmp.lt.s32.totalorder %s1772_s24, %s1772_s24 }
  0x2e   : > { %p1775_p10 = pnand %p1773_p9, %p1761_p13  ;;  %p1782_p0 = por %p1781_p12, %p1780_p2 }
  0x30   : > { %p1776_p1 = pneg %p1775_p10 }
  0x32   : > { %p1783_p6 = pnand %p1782_p0, %p1776_p1 }
  0x34   : > { %1786 = shalt.err (!%p1783_p6)
}
  0x35   : > { %s2033_s26 = smov 128   ;;  %s2034_s27 = smov 8  }
  0x36   : > { %1609 = dma.hbm_to_vmem [thread:$0]  (!%p2161_p11), %s2685_s2, 256, %s2154_s22, [#allocation7], %s2033_s26, %s2033_s26, %s2034_s27  }
  0x37   : > { %s2686_s3 = sld [smem:[#allocation27_spill]] }
  0x3d   : > { %s1787_s21 = scalar_lea.hbm %s2686_s3, 256 }
  0x3e   : > { %p1788_p2 = scmp.ne.s32.totalorder %s2686_s3, %s1787_s21  ;;  %p1794_p10 = scmp.lt.u32.totalorder %s1787_s21, %s2686_s3 }
  0x40   : > { %p1790_p1 = pnand %p1788_p2, %p1761_p13 }
  0x42   : > { %p1791_p6 = pneg %p1790_p1 }
  0x44   : > { %p1796_p3 = pnand %p1794_p10, %p1791_p6 }
  0x46   : > { %1799 = shalt.err (!%p1796_p3)
}
  0x47   : > { %s1800_s22 = scalar_lea.vmem %s2165_s25, 256  ;;  %p1808_p12 = scmp.lt.s32.totalorder %s2165_s25, %s2165_s25 }
  0x48   : > { %p1801_p5 = scmp.ne.s32.totalorder %s2165_s25, %s1800_s22  ;;  %p1809_p0 = scmp.lt.s32.totalorder %s1800_s22, %s1800_s22 }
  0x4a   : > { %p1803_p7 = pnand %p1801_p5, %p1761_p13  ;;  %p1810_p2 = por %p1809_p0, %p1808_p12 }
  0x4c   : > { %p1804_p9 = pneg %p1803_p7 }
  0x4e   : > { %p1811_p1 = pnand %p1810_p2, %p1804_p9 }
  0x50   : > { %1814 = shalt.err (!%p1811_p1)
}
  0x51   : > { %1612 = dma.hbm_to_vmem [thread:$0]  (!%p2161_p11), %s2686_s3, 256, %s2165_s25, [#allocation10], %s2033_s26, %s2033_s26, %s2034_s27  }
  0x52   : > { %s53_s19 = sadd.s32 1, %s2025_s15  ;;  %s62_s28 = sadd.s32 1, %s2017_s13 }
  0x53   : > { %p55_p13 = scmp.ge.s32.totalorder %s53_s19, 2  ;;  %p69_p6 = scmp.ne.s32.totalorder %s2017_s13, %s2013_s12 }
  0x54   : > { %p70_p10 = scmp.eq.s32.totalorder %s2029_s5, 0  ;;  %p1632_p3 = scmp.lt.s32.totalorder %s2029_s5, 2 }
  0x55   : > { %s2711_s19 = smov (%p55_p13, %s53_s19), 0  ;;  %p2688_p7 = scmp.eq.s32.totalorder %s2129_s16, 1 }
  0x56   : > { %2687 = sst [smem:[#allocation24_spill]] %s2711_s19  ;;  %p71_p5 = por %p70_p10, %p69_p6 }
  0x57   : > { %p2229_p9 = por %p2688_p7, %p69_p6  ;;  %s57_s29 = ssub.s32 %s2025_s15, %s2711_s19 }
  0x58   : > { %s363_s30 = sand.u32 1, %s2017_s13   ;;  %p60_p12 = scmp.eq.s32.totalorder %s57_s29, 0 }
  0x59   : > { %s2689_s23 = scalar_select %p2229_p9, 1, 0 }
  0x5a   : > { %s2236_s25 = sshll.u32 %s363_s30, 3  ;;  %s1537_s26 = sshll.u32 %s2025_s15, 7 }
  0x5b   : > { %s2240_s27 = scalar_select %p60_p12, %s2017_s13, %s62_s28  }
  0x5c   : > { %s2245_s24 = scalar_lea.hbm %s2657_s0, %s1537_s26  ;;  %s367_s22 = scalar_lea.vmem [#allocation3], %s2236_s25 }
  0x5d   : > { %2690 = sst [smem:[#allocation25_spill]] %s2240_s27  ;;  %s375_s11 = sshll.u32 %s367_s22, 4  ;;  %s2254_s11 = int_to_ptr.vmem [resolvable:$true] %s375_s11 }
  0x5e   : > { %p2250_p11 = pnand %p1632_p3, %p71_p5  ;;  %s2259_s10 = scalar_lea.hbm %s2658_s1, %s1537_s26 }
  0x5f   : > { %s364_s21 = scalar_lea.sflag [#allocation4], %s363_s30  ;;  %s1815_s2 = scalar_lea.hbm %s2245_s24, 128 }
  0x60   : > { %p1816_p0 = scmp.ne.s32.totalorder %s2245_s24, %s1815_s2  ;;  %p1817_p2 = pneg %p2250_p11 }
  0x61   : > { %s1820_s19 = scalar_lea.hbm %s2657_s0, 256  ;;  %p1821_p6 = scmp.lt.u32.totalorder %s2245_s24, %s2657_s0 }
  0x62   : > { %p1818_p1 = pnand %p1817_p2, %p1816_p0  ;;  %p1822_p10 = scmp.lt.u32.totalorder %s1820_s19, %s1815_s2 }
  0x63   : > { %p1824_p5 = scmp.lt.u32.totalorder %s1815_s2, %s2245_s24 }
  0x64   : > { %p1819_p13 = pneg %p1818_p1  ;;  %p1823_p3 = por %p1822_p10, %p1821_p6 }
  0x66   : > { %p1825_p7 = por %p1824_p5, %p1823_p3 }
  0x68   : > { %p1826_p12 = pnand %p1825_p7, %p1819_p13 }
  0x6a   : > { %1829 = shalt.err (!%p1826_p12)
}
  0x6b   : > { %s1830_s30 = scalar_lea.vmem %s2254_s11, 128  ;;  %s2035_s3 = smov [#allocation3]  }
  0x6c   : > { %p1831_p0 = scmp.ne.s32.totalorder %s2254_s11, %s1830_s30  ;;  %s1835_s26 = sshll.u32 %s2035_s3, 4  ;;  %s1836_s26 = int_to_ptr.vmem [resolvable:$false] %s1835_s26 }
  0x6d   : > { %s1837_s15 = scalar_lea.vmem %s1836_s26, 256  ;;  %p1838_p4 = scmp.lt.s32.totalorder %s2254_s11, %s1836_s26 }
  0x6e   : > { %p1833_p1 = pnand %p1831_p0, %p1817_p2  ;;  %p1839_p6 = scmp.lt.s32.totalorder %s1837_s15, %s1830_s30 }
  0x70   : > { %p1834_p9 = pneg %p1833_p1  ;;  %p1840_p10 = por %p1839_p6, %p1838_p4 }
  0x72   : > { %p1841_p3 = pnand %p1840_p10, %p1834_p9 }
  0x74   : > { %1844 = shalt.err (!%p1841_p3)
}
  0x75   : > { %1616 = dma.hbm_to_vmem [thread:$0]  (!%p2250_p11), %s2245_s24, 128, %s2254_s11, %s364_s21  }
  0x76   : > { %s382_s2 = sand.u32 1, %s2029_s5   ;;  %s386_s19 = scalar_lea.vmem [#allocation6], %s2236_s25 }
  0x77   : > { %s394_s27 = sshll.u32 %s386_s19, 4  ;;  %s383_s28 = scalar_lea.sflag [#allocation7], %s382_s2  ;;  %s395_s27 = int_to_ptr.vmem [resolvable:$true] %s394_s27 }
  0x78   : > { %s1845_s29 = scalar_lea.hbm %s2259_s10, 128  ;;  %s1850_s3 = scalar_lea.hbm %s2658_s1, 256 }
  0x79   : > { %p1846_p4 = scmp.ne.s32.totalorder %s2259_s10, %s1845_s29  ;;  %p1851_p5 = scmp.lt.u32.totalorder %s2259_s10, %s2658_s1 }
  0x7a   : > { %p1852_p7 = scmp.lt.u32.totalorder %s1850_s3, %s1845_s29  ;;  %p1854_p0 = scmp.lt.u32.totalorder %s1845_s29, %s2259_s10 }
  0x7b   : > { %p1848_p9 = pnand %p1846_p4, %p1817_p2 }
  0x7c   : > { %p1853_p12 = por %p1852_p7, %p1851_p5 }
  0x7d   : > { %p1849_p13 = pneg %p1848_p9 }
  0x7e   : > { %p1855_p1 = por %p1854_p0, %p1853_p12 }
  0x80   : > { %p1856_p6 = pnand %p1855_p1, %p1849_p13 }
  0x82   : > { %1859 = shalt.err (!%p1856_p6)
}
  0x83   : > { %s1860_s25 = scalar_lea.vmem %s395_s27, 128  ;;  %s2036_s24 = smov [#allocation6]  }
  0x84   : > { %p1861_p10 = scmp.ne.s32.totalorder %s395_s27, %s1860_s25  ;;  %s1865_s11 = sshll.u32 %s2036_s24, 4  ;;  %s1866_s11 = int_to_ptr.vmem [resolvable:$false] %s1865_s11 }
  0x85   : > { %s1867_s21 = scalar_lea.vmem %s1866_s11, 256  ;;  %p1868_p9 = scmp.lt.s32.totalorder %s395_s27, %s1866_s11 }
  0x86   : > { %p1863_p3 = pnand %p1861_p10, %p1817_p2  ;;  %p1869_p8 = scmp.lt.s32.totalorder %s1867_s21, %s1860_s25 }
  0x88   : > { %p1864_p4 = pneg %p1863_p3  ;;  %p1870_p5 = por %p1869_p8, %p1868_p9 }
  0x8a   : > { %p1871_p7 = pnand %p1870_p5, %p1864_p4 }
  0x8c   : > { %1874 = shalt.err (!%p1871_p7)
}
  0x8d   : > { %1619 = dma.hbm_to_vmem [thread:$0]  (!%p2250_p11), %s2259_s10, 128, %s395_s27, %s383_s28  }
  0x8e   : > { %p2692_p13 = scmp.ne.s32.totalorder %s2683_s20, 0 }
  0x8f   : > { %s2310_s2 = sand.u32 (!%p2692_p13), 1, %s2013_s12   ;;  %p2693_p8 = scmp.ne.s32.totalorder (!%p2692_p13), %s2680_s18, 0 }
  0x90   : > { %416 = sbr.rel (%p2692_p13) target bundleno = 805 (0x325), region = 48  ;;  %s2313_s19 = sshll.u32 (!%p2692_p13), %s2310_s2, 3 }
  0x91   : > { %s419_s29 = scalar_lea.sflag (!%p2692_p13), [#allocation4], %s2310_s2  ;;  %s422_s22 = scalar_lea.vmem (!%p2692_p13), [#allocation3], %s2313_s19 }
  0x97   : > { %1984 = dma.done.wait (%p2693_p8), %s419_s29, 128  }
  0x98   : > { %1986 = vsyncadd (%p2693_p8), %s419_s29, 4294967168  ;;  %s427_s20 = sand.u32 1, %s2129_s16   ;;  %s431_s10 = scalar_lea.vmem [#allocation6], %s2313_s19 }
  0x99   : > { %s428_s17 = scalar_lea.sflag [#allocation7], %s427_s20 }
  0x9a   : > { %1988 = dma.done.wait (%p2693_p8), %s428_s17, 128  }
  0x9b   : > { %1990 = vsyncadd (%p2693_p8), %s428_s17, 4294967168  ;;  %p2694_p11 = scmp.eq.s32.totalorder %s2129_s16, 0 }
  0x9d   : > { %1992 = dma.done.wait (%p2694_p11), [#allocation7], 256   ;;  %p2695_p2 = pmov %p2694_p11 }
  0x9f   : > { %1994 = vsyncadd (%p2695_p2), [#allocation7], 4294967040  ;;  %p2696_p12 = pmov %p2695_p2 }
  0xa0   : > { %p2697_p0 = pmov %p2695_p2 }
  0xa1   : > { %1996 = dma.done.wait (%p2696_p12), [#allocation10], 256  }
  0xa2   : > { %1998 = vsyncadd (%p2697_p0), [#allocation10], 4294967040  ;;  %v668_v0 = vlaneseq  ;;  %v2037_v1 = vmov 0.0|0.0   ;;  %vm2038_vm0 = vmmov 0   ;;  %v2039_v2 = vmov 0.0   ;;  %v512_v10 = vld [vmem:[#allocation8] sm:$0xff] }
  0xa3   : > { %1582 = vmatprep.subr.bf16.mxu0 %v2037_v1  ;;  %1572 = vmatprep.mubr.msk.f32.mxu0 %vm2038_vm0, %v2039_v2  ;;  %v513_v11 = vld [vmem:[#allocation8 + $0x8] sm:$0xff]  ;;  %v588_v14 = vld [vmem:[#allocation9] sm:$0xff]  ;;  %v589_v15 = vld [vmem:[#allocation9 + $0x8] sm:$0xff]  ;;  %vm514_vm2 = vcmask 130048   ;;  %v2040_v27 = vmov 1966171168  }
  0xa4   : > { %v2338_v3 = vshrl.u32 %v668_v0, 7  ;;  %v2340_v4 = vand.u32 127, %v668_v0  ;;  %1585 = vmatprep.subr.bf16.mxu1 %v2037_v1  ;;  %1579 = vmatprep.mubr.msk.f32.mxu1 %vm2038_vm0, %v2039_v2  ;;  %v1583_v13 = vpack.c.bf16 %v513_v11, %v512_v10  ;;  %v1586_v17 = vpack.c.bf16 %v589_v15, %v588_v14  ;;  %v509_v19 = vld [vmem:[%s422_s22] sm:$0xff]  ;;  %v510_v22 = vld [vmem:[%s431_s10] sm:$0xff]  ;;  %s808_s28 = sld [smem:[#allocation2]]  ;;  %p499_p1 = scmp.lt.s32.totalorder %s2021_s14, 1 }
  0xa5   : > { %v666_v28 = vunpack.c.l.s4 %v2040_v27  ;;  %v1551_v0 = vld [vmem:[%s2661_s4] ss:$0 sm:$0xff]  ;;  %vm783_vm3 = vcmask 261120   ;;  %vm1097_vm12 = vcmask 1041409   ;;  %vm1099_vm13 = vcmask 1042434   ;;  %s1557_s24 = sshll.u32 %s2021_s14, 7 }
  0xa6   : > { %vm828_vm1 = vcmp.eq.s32.totalorder %v2338_v3, %v2340_v4  ;;  %v842_v5 = vsub.s32 1, %v2338_v3  ;;  %v2348_v7 = vsub.s32 0, %v2338_v3  ;;  %v849_v9 = vsub.s32 2, %v2338_v3  ;;  %1584 = vmatpush3.bf16.msra.mxu0 %v1583_v13  ;;  %1587 = vmatpush3.bf16.msra.mxu1 %v1586_v17  ;;  %s500_s30 = scalar_select %p499_p1, %s2021_s14, 1 }
  0xa7   : > { %v1552_v6 = vsel %vm828_vm1, 1.0, %v2039_v2  ;;  %v863_v12 = vsub.s32 4, %v2338_v3  ;;  %v856_v21 = vsub.s32 3, %v2338_v3  ;;  %v870_v25 = vsub.s32 5, %v2338_v3  ;;  %s491_s11 = scalar_lea.vmem [#allocation12], %s2313_s19  ;;  %s484_s29 = scalar_lea.vmem [#allocation11], %s2313_s19 }
  0xa8   : > { %v2350_v8 = vmul.f32 1e+08, %v1552_v6  ;;  %v667_v29 = vunpack.c.0.s8 %v666_v28  ;;  %s1548_s3 = sshll.u32 %s500_s30, 3  ;;  %vm1101_vm14 = vcmask 1043459   ;;  %vm1103_vm15 = vcmask 1044484   ;;  %s1305_s21 = sshll.u32 %s491_s11, 4  ;;  %s2539_s21 = int_to_ptr.vmem [resolvable:$true] %s1305_s21 }
  0xa9   : > { %1573 = vmatmul.mubr.msk.f32.vlgmr.msra.gmra.mrb[0].mxu0 %vm514_vm2, %v509_v19  ;;  %1580 = vmatmul.mubr.msk.f32.vlgmr.msra.gmra.mrb[0].mxu1 %vm514_vm2, %v510_v22  ;;  %vm1105_vm0 = vcmask 1045509   ;;  %s508_s25 = scalar_lea.vmem %s2663_s6, %s1548_s3  ;;  %vm1107_vm1 = vcmask 1046534   ;;  %vm1109_vm2 = vcmask 1047559   ;;  %s1290_s22 = sshll.u32 %s484_s29, 4  ;;  %s2548_s22 = int_to_ptr.vmem [resolvable:$true] %s1290_s22 }
  0xaa   : > { %v843_v16 = vrot.slane %v2350_v8, %v842_v5  ;;  %v836_v18 = vrot.slane %v2350_v8, %v2348_v7  ;;  %v850_v20 = vrot.slane %v2350_v8, %v849_v9  ;;  %v864_v23 = vrot.slane %v2350_v8, %v863_v12  ;;  %s498_s17 = scalar_lea.vmem [#allocation14], %s2313_s19  ;;  %s2535_s18 = scalar_lea.hbm %s2665_s8, %s1557_s24 }
  0xab   : > { %v857_v24 = vrot.slane %v2350_v8, %v856_v21  ;;  %v871_v26 = vrot.slane %v2350_v8, %v870_v25  ;;  %v670_v30 = vsub.s32 %v667_v29, %v2338_v3  ;;  %v2041_v29 = vmov 0   ;;  %s1320_s27 = sshll.u32 %s498_s17, 4  ;;  %s2546_s3 = scalar_lea.hbm %s2664_s7, %s1557_s24  ;;  %s2557_s27 = int_to_ptr.vmem [resolvable:$true] %s1320_s27 }
  0xac   : > { %845 = vbcast.lane.b32.xlu1 %v843_v16, 256  ;;  %838 = vbcast.lane.b32.xlu0 %v836_v18, 256  ;;  %s1875_s14 = scalar_lea.vmem %s2539_s21, 128  ;;  %p2698_p10 = scmp.ne.s32.totalorder %s2689_s23, 0 }
  0xad   : > { %1693 = vset.pattern.permute.xlu0 %v2041_v29  ;;  %1694 = vset.pattern.permute.xlu1 %v2041_v29  ;;  %p1876_p6 = scmp.ne.s32.totalorder %s2539_s21, %s1875_s14  ;;  %s2042_s10 = smov [#allocation12]  }
  0xaf   : > { %p1877_p3 = pnand %p1876_p6, %p2698_p10 }
  0xb0   : > { %852 = vbcast.lane.b32.xlu1 %v850_v20, 256  ;;  %866 = vbcast.lane.b32.xlu0 %v864_v23, 256 }
  0xb1   : > { %p1878_p4 = pneg %p1877_p3 }
  0xb4   : > { %859 = vbcast.lane.b32.xlu1 %v857_v24, 256 }
  0xb8   : > { %873 = vbcast.lane.b32.xlu1 %v871_v26, 256 }
 0x17c   : > { %v584_v31 = vpop.f32.mrb[0].mxu0  ;;  %v659_v35 = vpop.f32.mrb[0].mxu1 }
 0x17d   : > { %v664_v32 = vcombine.high %v584_v31, %v584_v31  ;;  %v671_v33 = vrot.slane %v584_v31, %v670_v30  ;;  %v1574_v34 = vpop.f32.mrb[1].mxu0  ;;  %v1581_v36 = vpop.f32.mrb[1].mxu1  ;;  %v877_v31 = vsub.s32 6, %v2338_v3 }
 0x17e   : > { %v846_v34 = vpop.permute.xlu1 %845  ;;  %v839_v36 = vpop.permute.xlu0 %838 }
 0x17f   : > { %v678_v37 = vrot.slane %v664_v32, %v670_v30  ;;  %v679_v38 = vcombine.high %v671_v33, %v671_v33  ;;  %v687_v39 = vrot.slane %v671_v33, %v670_v30  ;;  %v878_v33 = vrot.slane %v2350_v8, %v877_v31 }
 0x181   : > { %v680_v40 = vcombine.high %v678_v37, %v678_v37  ;;  %v694_v41 = vrot.slane %v678_v37, %v670_v30  ;;  %v701_v42 = vrot.slane %v679_v38, %v670_v30  ;;  %v709_v43 = vcombine.high %v687_v39, %v687_v39 }
 0x182   : > { %v716_v44 = vrot.slane %v687_v39, %v2348_v7  ;;  %v867_v38 = vpop.permute.xlu0 %866 }
 0x183   : > { %v708_v45 = vrot.slane %v680_v40, %v670_v30  ;;  %v710_v46 = vcombine.high %v694_v41, %v694_v41  ;;  %v711_v47 = vcombine.high %v701_v42, %v701_v42  ;;  %v720_v48 = vrot.slane %v701_v42, %v2348_v7 }
 0x184   : > { %v724_v49 = vrot.slane %v709_v43, %v2348_v7  ;;  %v732_v50 = vrot.slane %v694_v41, %v2348_v7  ;;  %v753_v51 = vadd.f32 %v716_v44, %v659_v35  ;;  %v884_v30 = vsub.s32 7, %v2338_v3 }
 0x185   : > { %v712_v52 = vcombine.high %v708_v45, %v708_v45  ;;  %v728_v53 = vrot.slane %v711_v47, %v2348_v7  ;;  %v736_v54 = vrot.slane %v708_v45, %v2348_v7  ;;  %v740_v55 = vrot.slane %v710_v46, %v2348_v7 }
 0x186   : > { %1695 = vtanh.f32 %v753_v51  ;;  %v755_v56 = vadd.f32 %v724_v49, %v659_v35  ;;  %v754_v57 = vadd.f32 %v720_v48, %v659_v35  ;;  %v757_v58 = vadd.f32 %v732_v50, %v659_v35 }
 0x187   : > { %v744_v59 = vrot.slane %v712_v52, %v2348_v7  ;;  %v756_v60 = vadd.f32 %v728_v53, %v659_v35  ;;  %v758_v61 = vadd.f32 %v736_v54, %v659_v35  ;;  %v759_v62 = vadd.f32 %v740_v55, %v659_v35 }
 0x188   : > { %1697 = vtanh.f32 %v755_v56  ;;  %v885_v32 = vrot.slane %v2350_v8, %v884_v30  ;;  %v809_v40 = vstv %s808_s28  ;;  %s1879_s28 = sshll.u32 %s2042_s10, 4  ;;  %s1880_s28 = int_to_ptr.vmem [resolvable:$false] %s1879_s28 }
 0x189   : > { %1699 = vtanh.f32 %v754_v57  ;;  %v760_v63 = vadd.f32 %v744_v59, %v659_v35  ;;  %v853_v35 = vpop.permute.xlu1 %852  ;;  %s1881_s30 = scalar_lea.vmem %s1880_s28, 256  ;;  %p1882_p9 = scmp.lt.s32.totalorder %s2539_s21, %s1880_s28 }
 0x18a   : > { %1701 = vtanh.f32 %v756_v60  ;;  %p1883_p5 = scmp.lt.s32.totalorder %s1881_s30, %s1875_s14 }
 0x18b   : > { %1703 = vtanh.f32 %v757_v58 }
 0x18c   : > { %1705 = vtanh.f32 %v758_v61  ;;  %p1884_p7 = por %p1883_p5, %p1882_p9 }
 0x18d   : > { %1707 = vtanh.f32 %v759_v62  ;;  %v860_v37 = vpop.permute.xlu1 %859 }
 0x18e   : > { %1709 = vtanh.f32 %v760_v63  ;;  %p1885_p13 = pnand %p1884_p7, %p1878_p4 }
 0x190   : > { %v1696_v1 = vpop.eup %1695 }
 0x191   : > { %v775_v5 = vmul.f32 %v1696_v1, %v1551_v0  ;;  %v874_v39 = vpop.permute.xlu1 %873 }
 0x192   : > { %v1698_v6 = vpop.eup %1697 }
 0x193   : > { %v1700_v7 = vpop.eup %1699  ;;  %v784_v9 = vsel %vm783_vm3, %v775_v5, 0.0  ;;  %v777_v10 = vmul.f32 %v1698_v6, %v1551_v0 }
 0x194   : > { %v1702_v11 = vpop.eup %1701  ;;  %785 = vadd.xlane.f32.xlu0 %v784_v9  ;;  %v776_v12 = vmul.f32 %v1700_v7, %v1551_v0 }
 0x195   : > { %v1704_v13 = vpop.eup %1703  ;;  %v790_v14 = vsel %vm783_vm3, %v777_v10, 0.0  ;;  %v778_v15 = vmul.f32 %v1702_v11, %v1551_v0 }
 0x196   : > { %v1706_v16 = vpop.eup %1705  ;;  %791 = vadd.xlane.f32.xlu1 %v790_v14  ;;  %v787_v17 = vsel %vm783_vm3, %v776_v12, 0.0  ;;  %v779_v18 = vmul.f32 %v1704_v13, %v1551_v0 }
 0x197   : > { %v1708_v19 = vpop.eup %1707  ;;  %v793_v20 = vsel %vm783_vm3, %v778_v15, 0.0  ;;  %v780_v21 = vmul.f32 %v1706_v16, %v1551_v0 }
 0x198   : > { %788 = vadd.xlane.f32.xlu0 %v787_v17  ;;  %v1710_v22 = vpop.eup %1709  ;;  %v796_v23 = vsel %vm783_vm3, %v779_v18, 0.0  ;;  %v781_v24 = vmul.f32 %v1708_v19, %v1551_v0 }
 0x199   : > { %v799_v25 = vsel %vm783_vm3, %v780_v21, 0.0  ;;  %v782_v26 = vmul.f32 %v1710_v22, %v1551_v0 }
 0x19a   : > { %794 = vadd.xlane.f32.xlu1 %v793_v20  ;;  %v802_v27 = vsel %vm783_vm3, %v781_v24, 0.0 }
 0x19b   : > { %v805_v28 = vsel %vm783_vm3, %v782_v26, 0.0  ;;  %vm1112_vm3 = vcmask 64512  }
 0x19c   : > { %797 = vadd.xlane.f32.xlu0 %v796_v23 }
 0x19e   : > { %800 = vadd.xlane.f32.xlu1 %v799_v25 }
 0x1a0   : > { %803 = vadd.xlane.f32.xlu0 %v802_v27 }
 0x1a2   : > { %806 = vadd.xlane.f32.xlu1 %v805_v28 }
 0x1b3   : > { %887 = vbcast.lane.b32.xlu1 %v885_v32, 256 }
 0x1b6   : > { %880 = vbcast.lane.b32.xlu0 %v878_v33, 256 }
 0x221   : > { %v786_v41 = vpop.xlane.xlu0 %785 }
 0x222   : > { %v810_v42 = vadd.f32 %v809_v40, %v786_v41 }
 0x223   : > { %v792_v43 = vpop.xlane.xlu1 %791 }
 0x224   : > { %v2391_v44 = vsub.f32 %v810_v42, %v839_v36  ;;  %v812_v45 = vadd.f32 %v809_v40, %v792_v43 }
 0x225   : > { %v789_v46 = vpop.xlane.xlu0 %788 }
 0x226   : > { %v905_v47 = vand.u32 2147483647, %v2391_v44  ;;  %v2394_v8 = vsub.f32 %v812_v45, %v853_v35  ;;  %v811_v48 = vadd.f32 %v809_v40, %v789_v46  ;;  %1042 = vperm.xlu0 %1693, %v2391_v44   ;;  %vm961_vm4 = vcmp.ge.f32.partialorder %v2391_v44, 0.0 }
 0x227   : > { %v795_v49 = vpop.xlane.xlu1 %794 }
 0x228   : > { %v913_v50 = vsub.f32 0.0, %v905_v47  ;;  %v907_v51 = vand.u32 2147483647, %v2394_v8  ;;  %v2398_v52 = vsub.f32 %v811_v48, %v846_v34  ;;  %v813_v53 = vadd.f32 %v809_v40, %v795_v49 }
 0x229   : > { %v798_v54 = vpop.xlane.xlu0 %797  ;;  %vm963_vm5 = vcmp.ge.f32.partialorder %v2394_v8, 0.0 }
 0x22a   : > { %v921_v55 = vmul.f32 1.442695, %v913_v50  ;;  %v915_v56 = vsub.f32 0.0, %v907_v51  ;;  %v906_v57 = vand.u32 2147483647, %v2398_v52  ;;  %v2401_v58 = vsub.f32 %v813_v53, %v860_v37  ;;  %1045 = vperm.xlu1 %1694, %v2398_v52  }
 0x22b   : > { %v814_v59 = vadd.f32 %v809_v40, %v798_v54  ;;  %v801_v60 = vpop.xlane.xlu1 %800  ;;  %vm962_vm6 = vcmp.ge.f32.partialorder %v2398_v52, 0.0 }
 0x22c   : > { %1711 = vpow2.f32 %v921_v55  ;;  %v925_v61 = vmul.f32 1.442695, %v915_v56  ;;  %v914_v62 = vsub.f32 0.0, %v906_v57  ;;  %v908_v63 = vand.u32 2147483647, %v2401_v58  ;;  %1051 = vperm.xlu0 %1693, %v2401_v58  }
 0x22d   : > { %v2406_v0 = vsub.f32 %v814_v59, %v867_v38  ;;  %v815_v1 = vadd.f32 %v809_v40, %v801_v60  ;;  %v804_v5 = vpop.xlane.xlu0 %803  ;;  %v987_v56 = vmax.f32 %v2394_v8, 0.0  ;;  %v986_v59 = vmax.f32 %v2398_v52, 0.0 }
 0x22e   : > { %1713 = vpow2.f32 %v925_v61  ;;  %v923_v6 = vmul.f32 1.442695, %v914_v62  ;;  %v916_v7 = vsub.f32 0.0, %v908_v63  ;;  %1048 = vperm.xlu1 %1694, %v2394_v8   ;;  %v816_v13 = vadd.f32 %v809_v40, %v804_v5 }
 0x22f   : > { %v909_v9 = vand.u32 2147483647, %v2406_v0  ;;  %v2410_v10 = vsub.f32 %v815_v1, %v874_v39  ;;  %v807_v11 = vpop.xlane.xlu1 %806  ;;  %vm965_vm7 = vcmp.ge.f32.partialorder %v2406_v0, 0.0  ;;  %vm964_vm8 = vcmp.ge.f32.partialorder %v2401_v58, 0.0 }
 0x230   : > { %1715 = vpow2.f32 %v923_v6  ;;  %v927_v12 = vmul.f32 1.442695, %v916_v7  ;;  %v817_v17 = vadd.f32 %v809_v40, %v807_v11  ;;  %v985_v11 = vmax.f32 %v2391_v44, 0.0 }
 0x231   : > { %v917_v14 = vsub.f32 0.0, %v909_v9  ;;  %v910_v15 = vand.u32 2147483647, %v2410_v10  ;;  %v881_v16 = vpop.permute.xlu0 %880  ;;  %vm966_vm9 = vcmp.ge.f32.partialorder %v2410_v10, 0.0 }
 0x232   : > { %v2413_v18 = vsub.f32 %v816_v13, %v881_v16  ;;  %1054 = vperm.xlu1 %1694, %v2406_v0   ;;  %1717 = vpow2.f32 %v927_v12 }
 0x233   : > { %v929_v19 = vmul.f32 1.442695, %v917_v14  ;;  %v918_v20 = vsub.f32 0.0, %v910_v15  ;;  %v888_v21 = vpop.permute.xlu1 %887 }
 0x234   : > { %v911_v22 = vand.u32 2147483647, %v2413_v18  ;;  %v2417_v23 = vsub.f32 %v817_v17, %v888_v21  ;;  %1060 = vperm.xlu0 %1693, %v2413_v18   ;;  %vm967_vm11 = vcmp.ge.f32.partialorder %v2413_v18, 0.0 }
 0x235   : > { %1719 = vpow2.f32 %v929_v19  ;;  %v931_v24 = vmul.f32 1.442695, %v918_v20 }
 0x236   : > { %v1712_v25 = vpop.eup %1711  ;;  %v919_v26 = vsub.f32 0.0, %v911_v22  ;;  %v912_v27 = vand.u32 2147483647, %v2417_v23  ;;  %1057 = vperm.xlu1 %1694, %v2410_v10   ;;  %v989_v22 = vmax.f32 %v2406_v0, 0.0  ;;  %vm968_vm10 = vcmp.ge.f32.partialorder %v2417_v23, 0.0 }
 0x237   : > { %1721 = vpow2.f32 %v931_v24  ;;  %v937_v28 = vadd.f32 1.0, %v1712_v25 }
 0x238   : > { %v1714_v29 = vpop.eup %1713  ;;  %v933_v30 = vmul.f32 1.442695, %v919_v26  ;;  %v920_v31 = vsub.f32 0.0, %v912_v27 }
 0x239   : > { %1723 = vrcp.f32 %v937_v28  ;;  %v939_v32 = vadd.f32 1.0, %v1714_v29 }
 0x23a   : > { %v1716_v33 = vpop.eup %1715  ;;  %1725 = vpow2.f32 %v933_v30  ;;  %v935_v34 = vmul.f32 1.442695, %v920_v31 }
 0x23b   : > { %1727 = vrcp.f32 %v939_v32  ;;  %v938_v35 = vadd.f32 1.0, %v1716_v33 }
 0x23c   : > { %1729 = vpow2.f32 %v935_v34  ;;  %v2422_v36 = vpop.eup %1717 }
 0x23d   : > { %1731 = vrcp.f32 %v938_v35  ;;  %v940_v40 = vadd.f32 1.0, %v2422_v36 }
 0x23e   : > { %1733 = vlog2.f32 %v938_v35 }
 0x23f   : > { %v1720_v37 = vpop.eup %1719  ;;  %1735 = vlog2.f32 %v937_v28 }
 0x240   : > { %v941_v38 = vadd.f32 1.0, %v1720_v37  ;;  %1737 = vlog2.f32 %v939_v32 }
 0x241   : > { %v2424_v39 = vpop.eup %1721 }
 0x242   : > { %1739 = vrcp.f32 %v941_v38  ;;  %v942_v42 = vadd.f32 1.0, %v2424_v39 }
 0x243   : > { %v1724_v41 = vpop.eup %1723  ;;  %1741 = vlog2.f32 %v941_v38 }
 0x244   : > { %v2428_v43 = vpop.eup %1725  ;;  %v969_v45 = vmul.f32 %v1724_v41, %v1712_v25  ;;  %1743 = vrcp.f32 %v940_v40 }
 0x245   : > { %v1728_v46 = vpop.eup %1727  ;;  %v943_v50 = vadd.f32 1.0, %v2428_v43  ;;  %1745 = vrcp.f32 %v942_v42 }
 0x246   : > { %v2431_v47 = vpop.eup %1729  ;;  %v977_v48 = vsel %vm961_vm4, %v1724_v41, %v969_v45  ;;  %v971_v49 = vmul.f32 %v1728_v46, %v1714_v29  ;;  %1747 = vlog2.f32 %v940_v40 }
 0x247   : > { %v1732_v51 = vpop.eup %1731  ;;  %1197 = vperm.xlu0 %1693, %v977_v48   ;;  %v944_v53 = vadd.f32 1.0, %v2431_v47  ;;  %v1017_v17 = vmul.f32 %v977_v48, %v2391_v44 }
 0x248   : > { %v1734_v54 = vpop.eup %1733  ;;  %v970_v55 = vmul.f32 %v1732_v51, %v1716_v33  ;;  %v979_v62 = vsel %vm963_vm5, %v1728_v46, %v971_v49  ;;  %v991_v49 = vmax.f32 %v2413_v18, 0.0 }
 0x249   : > { %v1736_v57 = vpop.eup %1735  ;;  %v996_v60 = vmul.f32 0.6931472, %v1734_v54  ;;  %1749 = vrcp.f32 %v944_v53  ;;  %v1019_v13 = vmul.f32 %v979_v62, %v2394_v8 }
 0x24a   : > { %v1738_v61 = vpop.eup %1737  ;;  %v978_v63 = vsel %vm962_vm6, %v1732_v51, %v970_v55  ;;  %v994_v1 = vmul.f32 0.6931472, %v1736_v57  ;;  %1751 = vrcp.f32 %v943_v50 }
 0x24b   : > { %1203 = vperm.xlu0 %1693, %v979_v62   ;;  %v1018_v5 = vmul.f32 %v978_v63, %v2398_v52  ;;  %1200 = vperm.xlu1 %1694, %v978_v63   ;;  %v1010_v6 = vadd.f32 %v996_v60, %v986_v59  ;;  %v998_v7 = vmul.f32 0.6931472, %v1738_v61  ;;  %1753 = vlog2.f32 %v942_v42 }
 0x24c   : > { %v1740_v9 = vpop.eup %1739  ;;  %1755 = vlog2.f32 %v943_v50  ;;  %v1009_v19 = vadd.f32 %v994_v1, %v985_v11 }
 0x24d   : > { %v1742_v12 = vpop.eup %1741  ;;  %v973_v14 = vmul.f32 %v1740_v9, %v1720_v37  ;;  %v1026_v15 = vsub.f32 %v1010_v6, %v1018_v5  ;;  %v1011_v16 = vadd.f32 %v998_v7, %v987_v56  ;;  %1757 = vlog2.f32 %v944_v53 }
 0x24e   : > { %v1002_v52 = vmul.f32 0.6931472, %v1742_v12  ;;  %v1744_v20 = vpop.eup %1743  ;;  %v1025_v28 = vsub.f32 %v1009_v19, %v1017_v17  ;;  %v992_v56 = vmax.f32 %v2417_v23, 0.0 }
 0x24f   : > { %v981_v21 = vsel %vm965_vm7, %v1740_v9, %v973_v14  ;;  %1126 = vperm.xlu1 %1694, %v1026_v15   ;;  %v1746_v24 = vpop.eup %1745  ;;  %v1027_v8 = vsub.f32 %v1011_v16, %v1019_v13  ;;  %v972_v44 = vmul.f32 %v1744_v20, %v2422_v36  ;;  %v988_v36 = vmax.f32 %v2401_v58, 0.0 }
 0x250   : > { %1209 = vperm.xlu0 %1693, %v981_v21   ;;  %v1021_v25 = vmul.f32 %v981_v21, %v2406_v0  ;;  %v1013_v26 = vadd.f32 %v1002_v52, %v989_v22  ;;  %v1748_v27 = vpop.eup %1747  ;;  %v974_v37 = vmul.f32 %v1746_v24, %v2424_v39 }
 0x251   : > { %v1000_v33 = vmul.f32 0.6931472, %v1748_v27  ;;  %v980_v35 = vsel %vm964_vm8, %v1744_v20, %v972_v44 }
 0x252   : > { %v1029_v32 = vsub.f32 %v1013_v26, %v1021_v25  ;;  %v1020_v40 = vmul.f32 %v980_v35, %v2401_v58  ;;  %v982_v46 = vsel %vm966_vm9, %v1746_v24, %v974_v37 }
 0x253   : > { %v1750_v29 = vpop.eup %1749  ;;  %1129 = vperm.xlu1 %1694, %v1027_v8   ;;  %v1012_v41 = vadd.f32 %v1000_v33, %v988_v36  ;;  %v1022_v50 = vmul.f32 %v982_v46, %v2410_v10 }
 0x254   : > { %v1752_v30 = vpop.eup %1751  ;;  %1123 = vperm.xlu0 %1693, %v1025_v28   ;;  %v976_v0 = vmul.f32 %v1750_v29, %v2431_v47 }
 0x255   : > { %v1754_v31 = vpop.eup %1753  ;;  %v975_v38 = vmul.f32 %v1752_v30, %v2428_v43  ;;  %v990_v43 = vmax.f32 %v2410_v10, 0.0  ;;  %v1028_v58 = vsub.f32 %v1012_v41, %v1020_v40 }
 0x256   : > { %v1756_v34 = vpop.eup %1755  ;;  %v1004_v42 = vmul.f32 0.6931472, %v1754_v31  ;;  %v984_v48 = vsel %vm968_vm10, %v1750_v29, %v976_v0 }
 0x257   : > { %1135 = vperm.xlu1 %1694, %v1029_v32   ;;  %v1758_v45 = vpop.eup %1757  ;;  %v1006_v39 = vmul.f32 0.6931472, %v1756_v34  ;;  %v983_v47 = vsel %vm967_vm11, %v1752_v30, %v975_v38  ;;  %v1024_v57 = vmul.f32 %v984_v48, %v2417_v23 }
 0x258   : > { %1206 = vperm.xlu0 %1693, %v980_v35   ;;  %v1014_v51 = vadd.f32 %v1004_v42, %v990_v43  ;;  %v1008_v53 = vmul.f32 0.6931472, %v1758_v45  ;;  %v1023_v54 = vmul.f32 %v983_v47, %v2413_v18 }
 0x259   : > { %v1015_v55 = vadd.f32 %v1006_v39, %v991_v49 }
 0x25a   : > { %v1030_v59 = vsub.f32 %v1014_v51, %v1022_v50  ;;  %v1016_v60 = vadd.f32 %v1008_v53, %v992_v56 }
 0x25b   : > { %1218 = vperm.xlu1 %1694, %v984_v48   ;;  %v1031_v61 = vsub.f32 %v1015_v55, %v1023_v54  ;;  %v1187_v48 = vld [vmem:[%s508_s25] sm:$0xff]  ;;  %s2555_s25 = scalar_lea.hbm %s2666_s9, %s1557_s24 }
 0x25c   : > { %1212 = vperm.xlu0 %1693, %v982_v46   ;;  %v1032_v62 = vsub.f32 %v1016_v60, %v1024_v57 }
 0x25f   : > { %1132 = vperm.xlu1 %1694, %v1028_v58  }
 0x260   : > { %1215 = vperm.xlu0 %1693, %v983_v47  }
 0x263   : > { %1138 = vperm.xlu1 %1694, %v1030_v59  }
 0x264   : > { %1141 = vperm.xlu0 %1693, %v1031_v61  }
 0x267   : > { %1144 = vperm.xlu1 %1694, %v1032_v62  }
 0x268   : > { %1063 = vperm.xlu0 %1693, %v2417_v23   ;;  %v2473_v23 = vsub.s32 %v2340_v4, %v2338_v3 }
 0x2a5   : > { %v1043_v63 = vpop.permute.xlu0 %1042 }
 0x2a6   : > { %v1068_v29 = vrot.slane %v1043_v63, %v2473_v23 }
 0x2a9   : > { %v1046_v10 = vpop.permute.xlu1 %1045 }
 0x2aa   : > { %v1072_v4 = vrot.slane %v1046_v10, %v2473_v23 }
 0x2ab   : > { %v2463_v1 = vpop.permute.xlu0 %1051 }
 0x2ac   : > { %v1098_v35 = vsel %vm1097_vm12, %v1072_v4, %v1068_v29  ;;  %v1080_v47 = vrot.slane %v2463_v1, %v2473_v23 }
 0x2ad   : > { %v1049_v18 = vpop.permute.xlu1 %1048 }
 0x2ae   : > { %v1076_v27 = vrot.slane %v1049_v18, %v2473_v23 }
 0x2b0   : > { %v1100_v38 = vsel %vm1099_vm13, %v1076_v27, %v1098_v35 }
 0x2b1   : > { %v2465_v5 = vpop.permute.xlu1 %1054  ;;  %v1102_v55 = vsel %vm1101_vm14, %v1080_v47, %v1100_v38 }
 0x2b2   : > { %v1084_v42 = vrot.slane %v2465_v5, %v2473_v23 }
 0x2b3   : > { %v2467_v6 = vpop.permute.xlu0 %1060 }
 0x2b4   : > { %v1104_v59 = vsel %vm1103_vm15, %v1084_v42, %v1102_v55  ;;  %v1092_v63 = vrot.slane %v2467_v6, %v2473_v23 }
 0x2b5   : > { %v2469_v7 = vpop.permute.xlu1 %1057 }
 0x2b6   : > { %v1088_v43 = vrot.slane %v2469_v7, %v2473_v23 }
 0x2b8   : > { %v1106_v62 = vsel %vm1105_vm0, %v1088_v43, %v1104_v59 }
 0x2b9   : > { %v1108_v6 = vsel %vm1107_vm1, %v1092_v63, %v1106_v62 }
 0x2c6   : > { %v1198_v9 = vpop.permute.xlu0 %1197 }
 0x2c7   : > { %v1223_v52 = vrot.slane %v1198_v9, %v2473_v23 }
 0x2ca   : > { %v1204_v11 = vpop.permute.xlu0 %1203  ;;  %v1201_v12 = vpop.permute.xlu1 %1200 }
 0x2cb   : > { %v1227_v17 = vrot.slane %v1201_v12, %v2473_v23  ;;  %v1231_v21 = vrot.slane %v1204_v11, %v2473_v23 }
 0x2cd   : > { %v1252_v22 = vsel %vm1097_vm12, %v1227_v17, %v1223_v52 }
 0x2ce   : > { %v1127_v13 = vpop.permute.xlu1 %1126  ;;  %v1253_v44 = vsel %vm1099_vm13, %v1231_v21, %v1252_v22 }
 0x2cf   : > { %v1210_v14 = vpop.permute.xlu0 %1209  ;;  %v1153_v8 = vrot.slane %v1127_v13, %v2473_v23 }
 0x2d0   : > { %v1239_v33 = vrot.slane %v1210_v14, %v2473_v23 }
 0x2d2   : > { %v1130_v15 = vpop.permute.xlu1 %1129 }
 0x2d3   : > { %v1124_v16 = vpop.permute.xlu0 %1123  ;;  %v1157_v28 = vrot.slane %v1130_v15, %v2473_v23 }
 0x2d4   : > { %v1149_v24 = vrot.slane %v1124_v16, %v2473_v23 }
 0x2d6   : > { %v1136_v19 = vpop.permute.xlu1 %1135  ;;  %v1178_v30 = vsel %vm1097_vm12, %v1153_v8, %v1149_v24 }
 0x2d7   : > { %v1207_v20 = vpop.permute.xlu0 %1206  ;;  %v1179_v36 = vsel %vm1099_vm13, %v1157_v28, %v1178_v30  ;;  %v1165_v49 = vrot.slane %v1136_v19, %v2473_v23 }
 0x2d8   : > { %v1235_v25 = vrot.slane %v1207_v20, %v2473_v23 }
 0x2da   : > { %v1219_v3 = vpop.permute.xlu1 %1218  ;;  %v1254_v31 = vsel %vm1101_vm14, %v1235_v25, %v1253_v44 }
 0x2db   : > { %v1213_v26 = vpop.permute.xlu0 %1212  ;;  %v1255_v40 = vsel %vm1103_vm15, %v1239_v33, %v1254_v31  ;;  %v1251_v46 = vrot.slane %v1219_v3, %v2473_v23 }
 0x2dc   : > { %v1243_v32 = vrot.slane %v1213_v26, %v2473_v23 }
 0x2de   : > { %v1133_v34 = vpop.permute.xlu1 %1132  ;;  %v1256_v45 = vsel %vm1105_vm0, %v1243_v32, %v1255_v40 }
 0x2df   : > { %v1216_v37 = vpop.permute.xlu0 %1215  ;;  %v1161_v0 = vrot.slane %v1133_v34, %v2473_v23 }
 0x2e0   : > { %v1247_v41 = vrot.slane %v1216_v37, %v2473_v23 }
 0x2e1   : > { %v1180_v39 = vsel %vm1101_vm14, %v1161_v0, %v1179_v36 }
 0x2e2   : > { %v1257_v50 = vsel %vm1107_vm1, %v1247_v41, %v1256_v45  ;;  %v1139_v58 = vpop.permute.xlu1 %1138  ;;  %v1181_v57 = vsel %vm1103_vm15, %v1165_v49, %v1180_v39 }
 0x2e3   : > { %v1258_v51 = vsel %vm1109_vm2, %v1251_v46, %v1257_v50  ;;  %v1142_v53 = vpop.permute.xlu0 %1141  ;;  %v1169_v54 = vrot.slane %v1139_v58, %v2473_v23 }
 0x2e4   : > { %vm1260_vm4 = vcmp.lt.f32.partialorder %v1187_v48, %v1258_v51  ;;  %v1173_v56 = vrot.slane %v1142_v53, %v2473_v23 }
 0x2e5   : > { %v1553_v60 = vsel %vm1260_vm4, 1.0, %v2039_v2  ;;  %v1182_v61 = vsel %vm1105_vm0, %v1169_v54, %v1181_v57 }
 0x2e6   : > { %v1145_v10 = vpop.permute.xlu1 %1144  ;;  %1263 = vst.msk [vmem:[%s498_s17] sm:$0xff] %vm1112_vm3, %v1553_v60  ;;  %v1183_v5 = vsel %vm1107_vm1, %v1173_v56, %v1182_v61  ;;  %s2561_s17 = scalar_lea.sflag [#allocation13], %s427_s20 }
 0x2e7   : > { %v1064_v18 = vpop.permute.xlu0 %1063  ;;  %v1177_v2 = vrot.slane %v1145_v10, %v2473_v23 }
 0x2e8   : > { %v1096_v1 = vrot.slane %v1064_v18, %v2473_v23 }
 0x2e9   : > { %v1184_v7 = vsel %vm1109_vm2, %v1177_v2, %v1183_v5 }
 0x2ea   : > { %v1110_v9 = vsel %vm1109_vm2, %v1096_v1, %v1108_v6  ;;  %1186 = vst.msk [vmem:[%s491_s11] sm:$0xff] %vm1112_vm3, %v1184_v7 }
 0x2eb   : > { %1888 = shalt.err (!%p1885_p13)
}
 0x2ec   : > { %s1889_s16 = scalar_lea.hbm %s2535_s18, 128  ;;  %s1893_s11 = scalar_lea.hbm %s2665_s8, 256 }
 0x2ed   : > { %p1890_p8 = scmp.ne.s32.totalorder %s2535_s18, %s1889_s16  ;;  %p1894_p12 = scmp.lt.u32.totalorder %s2535_s18, %s2665_s8 }
 0x2ee   : > { %p1895_p0 = scmp.lt.u32.totalorder %s1893_s11, %s1889_s16  ;;  %p1897_p6 = scmp.lt.u32.totalorder %s1889_s16, %s2535_s18 }
 0x2ef   : > { %p1891_p11 = pnand %p1890_p8, %p2698_p10 }
 0x2f0   : > { %p1896_p1 = por %p1895_p0, %p1894_p12 }
 0x2f1   : > { %p1892_p2 = pneg %p1891_p11 }
 0x2f2   : > { %p1898_p3 = por %p1897_p6, %p1896_p1 }
 0x2f4   : > { %p1899_p4 = pnand %p1898_p3, %p1892_p2 }
 0x2f6   : > { %1902 = shalt.err (!%p1899_p4)
}
 0x2f7   : > { %1601 = dma.vmem_to_hbm [thread:$0]  (%p2698_p10), %s2539_s21, 128, %s2535_s18, %s2561_s17   ;;  %1113 = vst.msk [vmem:[%s484_s29] sm:$0xff] %vm1112_vm3, %v1110_v9 }
 0x2f8   : > { %s1265_s14 = scalar_lea.sflag [#allocation5], %s2310_s2  ;;  %s1903_s10 = scalar_lea.vmem %s2548_s22, 128 }
 0x2f9   : > { %p1904_p9 = scmp.ne.s32.totalorder %s2548_s22, %s1903_s10  ;;  %s2043_s28 = smov [#allocation11]  }
 0x2fa   : > { %s1907_s30 = sshll.u32 %s2043_s28, 4  ;;  %s1908_s30 = int_to_ptr.vmem [resolvable:$false] %s1907_s30 }
 0x2fb   : > { %p1905_p5 = pnand %p1904_p9, %p2698_p10  ;;  %s1909_s16 = scalar_lea.vmem %s1908_s30, 256 }
 0x2fc   : > { %p1910_p13 = scmp.lt.s32.totalorder %s2548_s22, %s1908_s30  ;;  %p1911_p8 = scmp.lt.s32.totalorder %s1909_s16, %s1903_s10 }
 0x2fd   : > { %p1906_p7 = pneg %p1905_p5 }
 0x2fe   : > { %p1912_p11 = por %p1911_p8, %p1910_p13 }
 0x300   : > { %p1913_p2 = pnand %p1912_p11, %p1906_p7 }
 0x302   : > { %1916 = shalt.err (!%p1913_p2)
}
 0x303   : > { %s1917_s2 = scalar_lea.hbm %s2546_s3, 128  ;;  %s1921_s29 = scalar_lea.hbm %s2664_s7, 256 }
 0x304   : > { %p1918_p12 = scmp.ne.s32.totalorder %s2546_s3, %s1917_s2  ;;  %p1922_p6 = scmp.lt.u32.totalorder %s2546_s3, %s2664_s7 }
 0x305   : > { %p1923_p3 = scmp.lt.u32.totalorder %s1921_s29, %s1917_s2  ;;  %p1925_p9 = scmp.lt.u32.totalorder %s1917_s2, %s2546_s3 }
 0x306   : > { %p1919_p0 = pnand %p1918_p12, %p2698_p10 }
 0x307   : > { %p1924_p4 = por %p1923_p3, %p1922_p6 }
 0x308   : > { %p1920_p1 = pneg %p1919_p0 }
 0x309   : > { %p1926_p5 = por %p1925_p9, %p1924_p4 }
 0x30b   : > { %p1927_p7 = pnand %p1926_p5, %p1920_p1 }
 0x30d   : > { %1930 = shalt.err (!%p1927_p7)
}
 0x30e   : > { %1600 = dma.vmem_to_hbm [thread:$0]  (%p2698_p10), %s2548_s22, 128, %s2546_s3, %s1265_s14  }
 0x30f   : > { %s1931_s24 = scalar_lea.vmem %s2557_s27, 128  ;;  %s2044_s11 = smov [#allocation14]  }
 0x310   : > { %p1932_p13 = scmp.ne.s32.totalorder %s2557_s27, %s1931_s24  ;;  %s1935_s26 = sshll.u32 %s2044_s11, 4  ;;  %s1936_s26 = int_to_ptr.vmem [resolvable:$false] %s1935_s26 }
 0x311   : > { %s1937_s15 = scalar_lea.vmem %s1936_s26, 256  ;;  %p1938_p2 = scmp.lt.s32.totalorder %s2557_s27, %s1936_s26 }
 0x312   : > { %p1933_p8 = pnand %p1932_p13, %p2698_p10  ;;  %p1939_p12 = scmp.lt.s32.totalorder %s1937_s15, %s1931_s24 }
 0x314   : > { %p1934_p11 = pneg %p1933_p8  ;;  %p1940_p0 = por %p1939_p12, %p1938_p2 }
 0x316   : > { %p1941_p1 = pnand %p1940_p0, %p1934_p11 }
 0x318   : > { %1944 = shalt.err (!%p1941_p1)
}
 0x319   : > { %s1945_s22 = scalar_lea.hbm %s2555_s25, 128  ;;  %s1949_s10 = scalar_lea.hbm %s2666_s9, 256 }
 0x31a   : > { %p1946_p6 = scmp.ne.s32.totalorder %s2555_s25, %s1945_s22  ;;  %p1950_p9 = scmp.lt.u32.totalorder %s2555_s25, %s2666_s9 }
 0x31b   : > { %p1951_p5 = scmp.lt.u32.totalorder %s1949_s10, %s1945_s22  ;;  %p1953_p13 = scmp.lt.u32.totalorder %s1945_s22, %s2555_s25 }
 0x31c   : > { %p1947_p3 = pnand %p1946_p6, %p2698_p10 }
 0x31d   : > { %p1952_p7 = por %p1951_p5, %p1950_p9 }
 0x31e   : > { %p1948_p4 = pneg %p1947_p3 }
 0x31f   : > { %p1954_p8 = por %p1953_p13, %p1952_p7 }
 0x321   : > { %p1955_p11 = pnand %p1954_p8, %p1948_p4 }
 0x323   : > { %1958 = shalt.err (!%p1955_p11)
}
 0x324   : > { %1602 = dma.vmem_to_hbm [thread:$0]  (%p2698_p10), %s2557_s27, 128, %s2555_s25, %s2561_s17  }
 0x325 PF: > { %s2699_s16 = sld [smem:[#allocation21_spill]]  ;;  %s2700_s2 = sld [smem:[#allocation23_spill]] }
 0x326   : > { %p2702_p12 = scmp.ge.s32.totalorder %s2029_s5, 2 }
 0x32b   : > { %s1332_s19 = sand.u32 1, %s2699_s16   ;;  %p2701_p2 = scmp.ne.s32.totalorder %s2700_s2, 0 }
 0x32c   : > { %s1333_s21 = scalar_lea.sflag [#allocation5], %s1332_s19 }
 0x32d   : > { %p1621_p0 = pnand %p2702_p12, %p2701_p2 }
 0x32f   : > { %2000 = dma.done.wait (!%p1621_p0), %s1333_s21, 128  }
 0x330   : > { %2002 = vsyncadd (!%p1621_p0), %s1333_s21, 4294967168  ;;  %s2703_s29 = sadd.s32 4294967294, %s2029_s5  }
 0x331   : > { %s1341_s18 = sand.u32 1, %s2703_s29  }
 0x332   : > { %s1342_s20 = scalar_lea.sflag [#allocation13], %s1341_s18 }
 0x333   : > { %2004 = dma.done.wait (!%p1621_p0), %s1342_s20, 256  }
 0x334   : > { %2006 = vsyncadd (!%p1621_p0), %s1342_s20, 4294967040  ;;  %s34_s5 = sadd.s32 1, %s2029_s5   ;;  %s2704_s23 = sld [smem:[#allocation25_spill]] }
 0x335   : > { %p31_p10 = scmp.ge.s32.totalorder %s34_s5, 4   ;;  %s2705_s14 = sld [smem:[#allocation22_spill]] }
 0x336   : > { %s2706_s15 = sld [smem:[#allocation24_spill]]  ;;  %s2707_s11 = smov %s2013_s12 }
 0x337   : > { %s2708_s12 = smov %s2017_s13  ;;  %33 = sbr.rel (!%p31_p10) target bundleno = 15 (0xf), region = 149 }
 0x33a   : > { %s2709_s13 = smov %s2704_s23 }
 0x33e   :  { %1356 = vsyncpa [#allocation4], 1 }
 0x33f   :  { %1358 = vsyncpa [#allocation4 + $0x1], 1 }
 0x340   :  { %1359 = vsyncpa [#allocation7], 1 }
 0x341   :  { %1361 = vsyncpa [#allocation7 + $0x1], 1 }
 0x342   :  { %1362 = vsyncpa [#allocation10], 1 }
 0x343   :  { %1363 = vsyncpa [#allocation5], 1 }
 0x344   :  { %1365 = vsyncpa [#allocation5 + $0x1], 1 }
 0x345   :  { %1366 = vsyncpa [#allocation13], 1 }
 0x346   :  { %1368 = vsyncpa [#allocation13 + $0x1], 1 }

</bundles_post_ra>
